<compile_context>
chip_gen: v5e
topology: v5e:2x2
jax: 0.10.0
libtpu: 0.0.40
codegen_flags: <defaults>
</compile_context>

<pallas_src>
import functools

import jax
import jax.numpy as jnp
from jax.experimental import pallas as pl
from jax.experimental.pallas import tpu as pltpu


def _round_up(x, m):
    return ((x + m - 1) // m) * m


# ----------------------------- Pallas kernel --------------------------------
def _conv_mm_kernel(p_ref, w_ref, b_ref, o_ref, acc_ref):
    """One (tm, tk) x (tk, Op) MXU pass, accumulated over the K grid axis.

    p_ref  : (tm, tk)  im2col patch tile (compute dtype)
    w_ref  : (tk, Op)  masked-weight tile (compute dtype)
    b_ref  : (1, Op)   bias row (f32)
    o_ref  : (tm, Op)  output tile (f32), resident across the K axis
    acc_ref: (tm, Op)  f32 VMEM accumulator scratch
    """
    k = pl.program_id(1)

    @pl.when(k == 0)
    def _():
        acc_ref[...] = jnp.zeros_like(acc_ref)

    acc_ref[...] += jnp.dot(p_ref[...], w_ref[...],
                            preferred_element_type=jnp.float32)

    @pl.when(k == pl.num_programs(1) - 1)
    def _():
        o_ref[...] = (acc_ref[...] + b_ref[...]).astype(o_ref.dtype)


def _choose_tiles(M, K, O, itemsize):
    """Pick MXU-friendly, VMEM-safe tile sizes."""
    Op = _round_up(O, 128)                 # lane-dense output / full MXU columns
    tk = K if K <= 1024 else 512           # only tile K when it is large
    Kp = K if tk == K else _round_up(K, tk)

    # Budget covers double-buffered inputs/outputs + accumulator scratch and
    # leaves plenty of headroom even for v5e's 16 MiB default / v7x's 64 MiB.
    budget = 24 * 1024 * 1024
    tm = 128
    for cand in (1024, 512, 256, 128):     # multiples of 128 -> no partial MXU
        footprint = (2 * cand * tk * itemsize      # patch tile (double-buffered)
                     + 2 * tk * Op * itemsize      # weight tile (double-buffered)
                     + 2 * Op * 4                  # bias row
                     + 2 * cand * Op * 4           # output tile (double-buffered)
                     + cand * Op * 4)              # f32 accumulator scratch
        if footprint <= budget:
            tm = cand
            break
    if M <= tm:                            # small problems: one tile, minimal pad
        tm = _round_up(M, 8)
    Mp = _round_up(M, tm)
    return tm, tk, Mp, Kp, Op


def _pallas_conv_matmul(patches, w_mat, bias_row):
    """patches: (M, K), w_mat: (K, O), bias_row: (1, O) f32 -> (M, O) f32."""
    M, K = patches.shape
    O = w_mat.shape[1]
    itemsize = jnp.dtype(patches.dtype).itemsize
    tm, tk, Mp, Kp, Op = _choose_tiles(M, K, O, itemsize)

    # Zero-pad to the tiled shapes (zero rows/cols contribute nothing to dot).
    if (Mp, Kp) != (M, K):
        patches = jnp.pad(patches, ((0, Mp - M), (0, Kp - K)))
    if (Kp, Op) != (K, O):
        w_mat = jnp.pad(w_mat, ((0, Kp - K), (0, Op - O)))
    if Op != O:
        bias_row = jnp.pad(bias_row, ((0, 0), (0, Op - O)))

    # Explicit scoped-VMEM limit with headroom; always below v7x's 64 MiB.
    vmem_bytes = (2 * tm * tk * itemsize + 2 * tk * Op * itemsize
                  + 2 * Op * 4 + 2 * tm * Op * 4 + tm * Op * 4)
    vmem_limit = int(min(max(2 * vmem_bytes, 32 * 1024 * 1024),
                         60 * 1024 * 1024))

    out = pl.pallas_call(
        _conv_mm_kernel,
        out_shape=jax.ShapeDtypeStruct((Mp, Op), jnp.float32),
        grid_spec=pltpu.PrefetchScalarGridSpec(
            num_scalar_prefetch=0,
            grid=(Mp // tm, Kp // tk),     # reduction (K) axis last
            in_specs=[
                pl.BlockSpec((tm, tk), lambda i, k: (i, k)),
                pl.BlockSpec((tk, Op), lambda i, k: (k, 0)),
                # Bias row is only Op*4 bytes; single-buffering it would save
                # negligible VMEM, so default pipelining is kept.
                pl.BlockSpec((1, Op), lambda i, k: (0, 0)),
            ],
            out_specs=pl.BlockSpec((tm, Op), lambda i, k: (i, 0)),
            scratch_shapes=[pltpu.VMEM((tm, Op), jnp.float32)],
        ),
        compiler_params=pltpu.CompilerParams(
            dimension_semantics=("parallel", "arbitrary"),
            vmem_limit_bytes=vmem_limit),
    )(patches, w_mat, bias_row)

    if (Mp, Op) != (M, O):
        out = out[:M, :O]
    return out


# ------------------------------ glue (JAX) -----------------------------------
def sparse_conv2d_forward(x, weight, mask, bias, stride, padding,
                          compute_dtype=jnp.float32):
    """Forward of SparseConv2d.

    x      : (N, C, H, W)   NCHW, float32
    weight : (O, C, KH, KW) dense values of the sparse parameter
    mask   : (O, C, KH, KW) binary sparsity mask
    bias   : (O,)
    stride, padding : (int, int)
    compute_dtype   : dtype for MXU operands (f32 matches PyTorch; bf16 gives
                      the higher v6e/v7x MXU rate with f32 accumulation).
    returns: (N, O, OH, OW) NCHW
    """
    N, C, H, W = x.shape
    O, _, KH, KW = weight.shape
    sh, sw = stride
    ph, pw = padding
    OH = (H + 2 * ph - KH) // sh + 1
    OW = (W + 2 * pw - KW) // sw + 1

    # im2col (channel-major, then kh, kw) — matches weight.reshape(O, C*KH*KW)
    xp = jnp.pad(x, ((0, 0), (0, 0), (ph, ph), (pw, pw)))
    cols = []
    for i in range(KH):
        for j in range(KW):
            cols.append(xp[:, :, i:i + sh * OH:sh, j:j + sw * OW:sw])  # (N,C,OH,OW)
    patches = jnp.stack(cols, axis=2)                  # (N, C, KH*KW, OH, OW)
    patches = patches.reshape(N, C * KH * KW, OH, OW)
    patches = patches.transpose(0, 2, 3, 1).reshape(N * OH * OW, C * KH * KW)
    patches = patches.astype(compute_dtype)

    # sparse weight == dense weight * mask
    w_sparse = (weight * mask).reshape(O, C * KH * KW).astype(compute_dtype)
    w_mat = w_sparse.T                                 # (K, O)
    bias_row = bias.reshape(1, O).astype(jnp.float32)

    out = _pallas_conv_matmul(patches, w_mat, bias_row)     # (M, O) f32
    out = out.reshape(N, OH, OW, O).transpose(0, 3, 1, 2)   # NCHW
    return out.astype(x.dtype)


# ------------------------------- demo ----------------------------------------
if __name__ == "__main__":
    key = jax.random.PRNGKey(0)
    k_x, k_w, k_b, k_m = jax.random.split(key, 4)

    # Small, deterministic config consistent with the module signature.
    N, C, H, W = 2, 4, 16, 16
    O, KH, KW = 8, 3, 3

    x = jax.random.normal(k_x, (N, C, H, W), dtype=jnp.float32)
    weight = jax.random.normal(k_w, (O, C, KH, KW), dtype=jnp.float32) * 0.1
    bias = jax.random.normal(k_b, (O,), dtype=jnp.float32) * 0.1
    mask = (jax.random.uniform(k_m, (O, C, KH, KW)) > 0.5).astype(jnp.float32)

    def reference(x, w, b, stride, padding):
        return jax.lax.conv_general_dilated(
            x, w, window_strides=stride,
            padding=[(padding[0], padding[0]), (padding[1], padding[1])],
            dimension_numbers=("NCHW", "OIHW", "NCHW"),
        ) + b.reshape(1, -1, 1, 1)

    for stride, padding in [((1, 1), (1, 1)), ((2, 2), (1, 1))]:
        fwd = jax.jit(functools.partial(sparse_conv2d_forward,
                                        stride=stride, padding=padding))
        y = jax.block_until_ready(fwd(x, weight, mask, bias))

        OH = (H + 2 * padding[0] - KH) // stride[0] + 1
        OW = (W + 2 * padding[1] - KW) // stride[1] + 1
        y_ref = reference(x, weight * mask, bias, stride, padding)

        assert y.shape == (N, O, OH, OW), y.shape
        assert jnp.allclose(y, y_ref, atol=1e-4, rtol=1e-4)

    print("KERNEL_OK")
</pallas_src>

<mosaic_0001>
module attributes {stable_mosaic.version = 11 : i64} {
  func.func @_conv_mm_kernel(%arg0: i32, %arg1: i32, %arg2: memref<512x36xf32, #tpu.memory_space<vmem>>, %arg3: memref<36x128xf32, #tpu.memory_space<vmem>>, %arg4: memref<1x128xf32, #tpu.memory_space<vmem>>, %arg5: memref<512x128xf32, #tpu.memory_space<vmem>>, %arg6: memref<512x128xf32, #tpu.memory_space<vmem>>) attributes {dimension_semantics = [#tpu.dimension_semantics<parallel>, #tpu.dimension_semantics<arbitrary>], iteration_bounds = array<i64: 1, 1>, scalar_prefetch = 0 : i64, scratch_operands = 1 : i64, tpu.core_type = #tpu.core_type<tc>, window_params = [{transform_indices = @transform_0, window_bounds = array<i64: 512, 36>}, {transform_indices = @transform_1, window_bounds = array<i64: 36, 128>}, {pipeline_mode = #tpu.pipeline_mode<synchronous>, transform_indices = @transform_2, window_bounds = array<i64: 1, 128>}, {transform_indices = @transform_3, window_bounds = array<i64: 512, 128>}]} {
    %c0_i32 = arith.constant 0 : i32
    %0 = arith.cmpi eq, %arg1, %c0_i32 : i32
    %1 = arith.extui %0 : i1 to i32
    %c0_i32_0 = arith.constant 0 : i32
    %2 = arith.cmpi ne, %1, %c0_i32_0 : i32
    scf.if %2 {
      %cst_10 = arith.constant 0.000000e+00 : f32
      %12 = vector.broadcast %cst_10 : f32 to vector<512x128xf32>
      %c0_11 = arith.constant 0 : index
      %c0_12 = arith.constant 0 : index
      %13 = vector.load %arg6[%c0_11, %c0_12] : memref<512x128xf32, #tpu.memory_space<vmem>>, vector<512x128xf32>
      tpu.vector_store %arg6[%c0_11, %c0_12], %12 {strides = array<i32>} : memref<512x128xf32, #tpu.memory_space<vmem>>, vector<512x128xf32>,
    } else {
    }
    %c0 = arith.constant 0 : index
    %c0_1 = arith.constant 0 : index
    %3 = vector.load %arg6[%c0, %c0_1] : memref<512x128xf32, #tpu.memory_space<vmem>>, vector<512x128xf32>
    %c0_2 = arith.constant 0 : index
    %c0_3 = arith.constant 0 : index
    %4 = vector.load %arg2[%c0_2, %c0_3] : memref<512x36xf32, #tpu.memory_space<vmem>>, vector<512x36xf32>
    %c0_4 = arith.constant 0 : index
    %c0_5 = arith.constant 0 : index
    %5 = vector.load %arg3[%c0_4, %c0_5] : memref<36x128xf32, #tpu.memory_space<vmem>>, vector<36x128xf32>
    %cst = arith.constant dense<0.000000e+00> : vector<512x128xf32>
    %6 = tpu.matmul %4, %5, %cst {dimension_numbers = #tpu.dot_dimension_numbers<[1], [0], [0], [1], [0, 0, 1, 1], [], []>} : vector<512x36xf32>, vector<36x128xf32>, vector<512x128xf32> -> vector<512x128xf32>
    %7 = arith.addf %3, %6 : vector<512x128xf32>
    %c0_6 = arith.constant 0 : index
    %c0_7 = arith.constant 0 : index
    %8 = vector.load %arg6[%c0_6, %c0_7] : memref<512x128xf32, #tpu.memory_space<vmem>>, vector<512x128xf32>
    tpu.vector_store %arg6[%c0_6, %c0_7], %7 {strides = array<i32>} : memref<512x128xf32, #tpu.memory_space<vmem>>, vector<512x128xf32>,
    %c0_i32_8 = arith.constant 0 : i32
    %9 = arith.cmpi eq, %arg1, %c0_i32_8 : i32
    %10 = arith.extui %9 : i1 to i32
    %c0_i32_9 = arith.constant 0 : i32
    %11 = arith.cmpi ne, %10, %c0_i32_9 : i32
    scf.if %11 {
      %c0_10 = arith.constant 0 : index
      %c0_11 = arith.constant 0 : index
      %12 = vector.load %arg6[%c0_10, %c0_11] : memref<512x128xf32, #tpu.memory_space<vmem>>, vector<512x128xf32>
      %c0_12 = arith.constant 0 : index
      %c0_13 = arith.constant 0 : index
      %13 = vector.load %arg4[%c0_12, %c0_13] : memref<1x128xf32, #tpu.memory_space<vmem>>, vector<1x128xf32>
      %14 = vector.broadcast %13 : vector<1x128xf32> to vector<512x128xf32>
      %15 = arith.addf %12, %14 : vector<512x128xf32>
      %c0_14 = arith.constant 0 : index
      %c0_15 = arith.constant 0 : index
      %16 = vector.load %arg5[%c0_14, %c0_15] : memref<512x128xf32, #tpu.memory_space<vmem>>, vector<512x128xf32>
      tpu.vector_store %arg5[%c0_14, %c0_15], %15 {strides = array<i32>} : memref<512x128xf32, #tpu.memory_space<vmem>>, vector<512x128xf32>,
    } else {
    }
    return
  }
  func.func @transform_0(%arg0: i32, %arg1: i32) -> (i32, i32) {
    %c0_i32 = arith.constant 0 : i32
    return %arg0, %arg1 : i32, i32
  }
  func.func @transform_1(%arg0: i32, %arg1: i32) -> (i32, i32) {
    %c0_i32 = arith.constant 0 : i32
    %c0_i32_0 = arith.constant 0 : i32
    return %arg1, %c0_i32 : i32, i32
  }
  func.func @transform_2(%arg0: i32, %arg1: i32) -> (i32, i32) {
    %c0_i32 = arith.constant 0 : i32
    %c0_i32_0 = arith.constant 0 : i32
    %c0_i32_1 = arith.constant 0 : i32
    return %c0_i32, %c0_i32_0 : i32, i32
  }
  func.func @transform_3(%arg0: i32, %arg1: i32) -> (i32, i32) {
    %c0_i32 = arith.constant 0 : i32
    %c0_i32_0 = arith.constant 0 : i32
    return %arg0, %c0_i32 : i32, i32
  }
}

</mosaic_0001>

<bundles_post_ra>
// kernel: mul.1
= control target key start
LH: loop header
LB: loop body
LE: loop exit
PB: predicated region body
PF: predicated region fallthrough
CT: control target
= control target key end

     0   :  { %s210_s0 = inlined_call_operand.vmem [shape: f32[8,4,3,3], index: 0, kind: input, shape index: {}]   ;;  %s211_s1 = inlined_call_operand.vmem [shape: f32[8,4,3,3], index: 1, kind: input, shape index: {}]   ;;  %s212_s2 = inlined_call_operand.vmem [shape: f32[8,4,3,3], index: 2, kind: output, shape index: {}]  }
   0x1   :  { %v3_v0 = vld [vmem:[%s210_s0] sm:$0xf]  ;;  %v90_v2 = vld [vmem:[%s210_s0 + $0xc] sm:$0xf]  ;;  %v93_v5 = vld [vmem:[%s210_s0 + $0x18] sm:$0xf] }
   0x2   :  { %v4_v1 = vld [vmem:[%s211_s1] sm:$0xf]  ;;  %v91_v4 = vld [vmem:[%s211_s1 + $0xc] sm:$0xf]  ;;  %v94_v6 = vld [vmem:[%s211_s1 + $0x18] sm:$0xf] }
   0x3   :  { %v7_v3 = vmul.f32 %v4_v1, %v3_v0  ;;  %v16_v7 = vmul.f32 %v91_v4, %v90_v2  ;;  %v26_v8 = vmul.f32 %v94_v6, %v93_v5  ;;  %v96_v9 = vld [vmem:[%s210_s0 + $0x4] sm:$0xf]  ;;  %v99_v11 = vld [vmem:[%s210_s0 + $0x10] sm:$0xf]  ;;  %v102_v14 = vld [vmem:[%s210_s0 + $0x1c] sm:$0xf] }
   0x4   :  { %v97_v10 = vld [vmem:[%s211_s1 + $0x4] sm:$0xf]  ;;  %v100_v13 = vld [vmem:[%s211_s1 + $0x10] sm:$0xf]  ;;  %v103_v16 = vld [vmem:[%s211_s1 + $0x1c] sm:$0xf] }
   0x5   :  { %9 = vst [vmem:[%s212_s2] sm:$0xf] %v7_v3  ;;  %v36_v12 = vmul.f32 %v97_v10, %v96_v9  ;;  %v46_v15 = vmul.f32 %v100_v13, %v99_v11  ;;  %v105_v17 = vld [vmem:[%s210_s0 + $0x8] sm:$0xf]  ;;  %v56_v18 = vmul.f32 %v103_v16, %v102_v14  ;;  %v108_v20 = vld [vmem:[%s210_s0 + $0x14] sm:$0xf] }
   0x6   :  { %92 = vst [vmem:[%s212_s2 + $0xc] sm:$0xf] %v16_v7  ;;  %v106_v19 = vld [vmem:[%s211_s1 + $0x8] sm:$0xf]  ;;  %v109_v22 = vld [vmem:[%s211_s1 + $0x14] sm:$0xf] }
   0x7   :  { %95 = vst [vmem:[%s212_s2 + $0x18] sm:$0xf] %v26_v8  ;;  %v66_v21 = vmul.f32 %v106_v19, %v105_v17  ;;  %v111_v23 = vld [vmem:[%s210_s0 + $0x20] sm:$0xf]  ;;  %v76_v24 = vmul.f32 %v109_v22, %v108_v20 }
   0x8   :  { %98 = vst [vmem:[%s212_s2 + $0x4] sm:$0xf] %v36_v12  ;;  %v112_v25 = vld [vmem:[%s211_s1 + $0x20] sm:$0xf] }
   0x9   :  { %101 = vst [vmem:[%s212_s2 + $0x10] sm:$0xf] %v46_v15  ;;  %v86_v26 = vmul.f32 %v112_v25, %v111_v23 }
   0xa   :  { %104 = vst [vmem:[%s212_s2 + $0x1c] sm:$0xf] %v56_v18 }
   0xb   :  { %107 = vst [vmem:[%s212_s2 + $0x8] sm:$0xf] %v66_v21 }
   0xc   :  { %110 = vst [vmem:[%s212_s2 + $0x14] sm:$0xf] %v76_v24 }
   0xd   :  { %113 = vst [vmem:[%s212_s2 + $0x20] sm:$0xf] %v86_v26 }

// kernel: sparse_conv2d_forward.1
= control target key start
LH: loop header
LB: loop body
LE: loop exit
PB: predicated region body
PF: predicated region fallthrough
CT: control target
= control target key end

     0   :  { %vm408_vm0 = vcmask 1043456   ;;  %vm215_vm1 = vcmask 293888   ;;  %s1585_s1 = inlined_call_operand.vmem [shape: f32[36,128], index: 1, kind: input, shape index: {}]   ;;  %s1586_s0 = inlined_call_operand.vmem [shape: f32[512,36], index: 0, kind: input, shape index: {}]   ;;  %s1587_s2 = inlined_call_operand.vmem [shape: f32[1,128], index: 2, kind: input, shape index: {}]   ;;  %s1588_s3 = inlined_call_operand.vmem [shape: f32[512,128], index: 3, kind: output, shape index: {}]  }
   0x1   :  { %v214_v0 = vld [vmem:[%s1585_s1 + $0x20] sm:$0xf]  ;;  %v213_v1 = vld [vmem:[%s1585_s1 + $0x18] sm:$0xff]  ;;  %v212_v2 = vld [vmem:[%s1585_s1 + $0x10] sm:$0xff] }
   0x2   :  { %1018 = vmatpush.msk.msra.mxu2 %vm408_vm0, %v214_v0  ;;  %1019 = vmatpush.msk.msra.mxu3 %vm408_vm0, %v214_v0  ;;  %v211_v3 = vld [vmem:[%s1585_s1 + $0x8] sm:$0xff]  ;;  %v210_v4 = vld [vmem:[%s1585_s1] sm:$0xff]  ;;  %v180_v13 = vld [vmem:[%s1586_s0 + $0x110] sm:$0xff] }
   0x3   :  { %952 = vmatpush.msk.msra.mxu0 %vm408_vm0, %v214_v0  ;;  %1017 = vmatpush.msk.msra.mxu1 %vm408_vm0, %v214_v0  ;;  %v178_v5 = vld [vmem:[%s1586_s0 + $0x100] sm:$0xff]  ;;  %v179_v9 = vld [vmem:[%s1586_s0 + $0x108] sm:$0xff]  ;;  %v196_v14 = vld [vmem:[%s1586_s0 + $0x190] sm:$0xff] }
   0x4   :  { %1021 = vmatpush.msra.mxu2 %v213_v1  ;;  %1022 = vmatpush.msra.mxu3 %v213_v1  ;;  %v194_v6 = vld [vmem:[%s1586_s0 + $0x180] sm:$0xff]  ;;  %v195_v10 = vld [vmem:[%s1586_s0 + $0x188] sm:$0xff]  ;;  %v148_v15 = vld [vmem:[%s1586_s0 + $0x10] sm:$0xff] }
   0x5   :  { %424 = vmatpush.msra.mxu0 %v213_v1  ;;  %1020 = vmatpush.msra.mxu1 %v213_v1  ;;  %v146_v7 = vld [vmem:[%s1586_s0] sm:$0xff]  ;;  %v147_v11 = vld [vmem:[%s1586_s0 + $0x8] sm:$0xff]  ;;  %v164_v16 = vld [vmem:[%s1586_s0 + $0x90] sm:$0xff] }
   0x6   :  { %1024 = vmatpush.msra.mxu2 %v212_v2  ;;  %1025 = vmatpush.msra.mxu3 %v212_v2  ;;  %v162_v8 = vld [vmem:[%s1586_s0 + $0x80] sm:$0xff]  ;;  %v163_v12 = vld [vmem:[%s1586_s0 + $0x88] sm:$0xff]  ;;  %v181_v17 = vld [vmem:[%s1586_s0 + $0x118] sm:$0xff] }
   0x7   :  { %425 = vmatpush.msra.mxu0 %v212_v2  ;;  %1023 = vmatpush.msra.mxu1 %v212_v2  ;;  %v197_v18 = vld [vmem:[%s1586_s0 + $0x198] sm:$0xff]  ;;  %v182_v21 = vld [vmem:[%s1586_s0 + $0x120] sm:$0xff]  ;;  %v183_v25 = vld [vmem:[%s1586_s0 + $0x128] sm:$0xff] }
   0x8   :  { %1027 = vmatpush.msra.mxu2 %v211_v3  ;;  %1028 = vmatpush.msra.mxu3 %v211_v3  ;;  %v149_v19 = vld [vmem:[%s1586_s0 + $0x18] sm:$0xff]  ;;  %v198_v22 = vld [vmem:[%s1586_s0 + $0x1a0] sm:$0xff]  ;;  %v199_v26 = vld [vmem:[%s1586_s0 + $0x1a8] sm:$0xff] }
   0x9   :  { %426 = vmatpush.msra.mxu0 %v211_v3  ;;  %1026 = vmatpush.msra.mxu1 %v211_v3  ;;  %v165_v20 = vld [vmem:[%s1586_s0 + $0x98] sm:$0xff]  ;;  %v150_v23 = vld [vmem:[%s1586_s0 + $0x20] sm:$0xff]  ;;  %v151_v27 = vld [vmem:[%s1586_s0 + $0x28] sm:$0xff] }
   0xa   :  { %1030 = vmatpush.msra.mxu2 %v210_v4  ;;  %1031 = vmatpush.msra.mxu3 %v210_v4  ;;  %v166_v24 = vld [vmem:[%s1586_s0 + $0xa0] sm:$0xff]  ;;  %v167_v28 = vld [vmem:[%s1586_s0 + $0xa8] sm:$0xff]  ;;  %v184_v29 = vld [vmem:[%s1586_s0 + $0x130] sm:$0xff] }
   0xb   :  { %985 = vmatmul.msk.f32.vlgmr.msra.gmra.mxu2 %vm215_vm1, %v178_v5  ;;  %1001 = vmatmul.msk.f32.vlgmr.msra.gmra.mxu3 %vm215_vm1, %v194_v6  ;;  %v200_v30 = vld [vmem:[%s1586_s0 + $0x1b0] sm:$0xff]  ;;  %v185_v33 = vld [vmem:[%s1586_s0 + $0x138] sm:$0xff]  ;;  %v186_v37 = vld [vmem:[%s1586_s0 + $0x140] sm:$0xff] }
   0xc   :  { %427 = vmatpush.msra.mxu0 %v210_v4  ;;  %1029 = vmatpush.msra.mxu1 %v210_v4  ;;  %v152_v31 = vld [vmem:[%s1586_s0 + $0x30] sm:$0xff]  ;;  %v201_v34 = vld [vmem:[%s1586_s0 + $0x1b8] sm:$0xff]  ;;  %v202_v38 = vld [vmem:[%s1586_s0 + $0x1c0] sm:$0xff] }
   0xd   :  { %953 = vmatmul.msk.f32.vlgmr.msra.gmra.mxu0 %vm215_vm1, %v146_v7  ;;  %969 = vmatmul.msk.f32.vlgmr.msra.gmra.mxu1 %vm215_vm1, %v162_v8  ;;  %v168_v32 = vld [vmem:[%s1586_s0 + $0xb0] sm:$0xff]  ;;  %v153_v35 = vld [vmem:[%s1586_s0 + $0x38] sm:$0xff]  ;;  %v154_v39 = vld [vmem:[%s1586_s0 + $0x40] sm:$0xff] }
   0xe   :  { %v169_v36 = vld [vmem:[%s1586_s0 + $0xb8] sm:$0xff]  ;;  %v170_v40 = vld [vmem:[%s1586_s0 + $0xc0] sm:$0xff]  ;;  %v187_v41 = vld [vmem:[%s1586_s0 + $0x148] sm:$0xff] }
   0xf   :  { %v203_v42 = vld [vmem:[%s1586_s0 + $0x1c8] sm:$0xff]  ;;  %v188_v45 = vld [vmem:[%s1586_s0 + $0x150] sm:$0xff]  ;;  %v189_v49 = vld [vmem:[%s1586_s0 + $0x158] sm:$0xff] }
  0x10   :  { %v155_v43 = vld [vmem:[%s1586_s0 + $0x48] sm:$0xff]  ;;  %v204_v46 = vld [vmem:[%s1586_s0 + $0x1d0] sm:$0xff]  ;;  %v205_v50 = vld [vmem:[%s1586_s0 + $0x1d8] sm:$0xff] }
  0x11   :  { %v171_v44 = vld [vmem:[%s1586_s0 + $0xc8] sm:$0xff]  ;;  %v156_v47 = vld [vmem:[%s1586_s0 + $0x50] sm:$0xff]  ;;  %v157_v51 = vld [vmem:[%s1586_s0 + $0x58] sm:$0xff] }
  0x12   :  { %v172_v48 = vld [vmem:[%s1586_s0 + $0xd0] sm:$0xff]  ;;  %v173_v52 = vld [vmem:[%s1586_s0 + $0xd8] sm:$0xff]  ;;  %v190_v53 = vld [vmem:[%s1586_s0 + $0x160] sm:$0xff] }
  0x13   :  { %986 = vmatmul.msk.f32.gmra.mxu2 %vm215_vm1, %v179_v9  ;;  %1002 = vmatmul.msk.f32.gmra.mxu3 %vm215_vm1, %v195_v10  ;;  %v206_v54 = vld [vmem:[%s1586_s0 + $0x1e0] sm:$0xff]  ;;  %v191_v57 = vld [vmem:[%s1586_s0 + $0x168] sm:$0xff]  ;;  %v192_v61 = vld [vmem:[%s1586_s0 + $0x170] sm:$0xff] }
  0x14   :  { %v158_v55 = vld [vmem:[%s1586_s0 + $0x60] sm:$0xff]  ;;  %v207_v58 = vld [vmem:[%s1586_s0 + $0x1e8] sm:$0xff]  ;;  %v208_v62 = vld [vmem:[%s1586_s0 + $0x1f0] sm:$0xff] }
  0x15   :  { %954 = vmatmul.msk.f32.gmra.mxu0 %vm215_vm1, %v147_v11  ;;  %970 = vmatmul.msk.f32.gmra.mxu1 %vm215_vm1, %v163_v12  ;;  %v174_v56 = vld [vmem:[%s1586_s0 + $0xe0] sm:$0xff]  ;;  %v159_v59 = vld [vmem:[%s1586_s0 + $0x68] sm:$0xff]  ;;  %v160_v63 = vld [vmem:[%s1586_s0 + $0x70] sm:$0xff] }
  0x16   :  { %v175_v60 = vld [vmem:[%s1586_s0 + $0xe8] sm:$0xff]  ;;  %v176_v0 = vld [vmem:[%s1586_s0 + $0xf0] sm:$0xff]  ;;  %v193_v1 = vld [vmem:[%s1586_s0 + $0x178] sm:$0xff] }
  0x17   :  { %v209_v2 = vld [vmem:[%s1586_s0 + $0x1f8] sm:$0xff]  ;;  %v1327_v5 = vld [vmem:[%s1587_s2] ss:$0 sm:$0xff] }
  0x18   :  { %v161_v3 = vld [vmem:[%s1586_s0 + $0x78] sm:$0xff] }
  0x19   :  { %v177_v4 = vld [vmem:[%s1586_s0 + $0xf8] sm:$0xff] }
  0x1b   :  { %987 = vmatmul.msk.f32.gmra.mxu2 %vm215_vm1, %v180_v13  ;;  %1003 = vmatmul.msk.f32.gmra.mxu3 %vm215_vm1, %v196_v14 }
  0x1d   :  { %955 = vmatmul.msk.f32.gmra.mxu0 %vm215_vm1, %v148_v15  ;;  %971 = vmatmul.msk.f32.gmra.mxu1 %vm215_vm1, %v164_v16 }
  0x23   :  { %988 = vmatmul.msk.f32.gmra.mxu2 %vm215_vm1, %v181_v17  ;;  %1004 = vmatmul.msk.f32.gmra.mxu3 %vm215_vm1, %v197_v18 }
  0x25   :  { %956 = vmatmul.msk.f32.gmra.mxu0 %vm215_vm1, %v149_v19  ;;  %972 = vmatmul.msk.f32.gmra.mxu1 %vm215_vm1, %v165_v20 }
  0x2b   :  { %989 = vmatmul.msk.f32.gmra.mxu2 %vm215_vm1, %v182_v21  ;;  %1005 = vmatmul.msk.f32.gmra.mxu3 %vm215_vm1, %v198_v22 }
  0x2d   :  { %957 = vmatmul.msk.f32.gmra.mxu0 %vm215_vm1, %v150_v23  ;;  %973 = vmatmul.msk.f32.gmra.mxu1 %vm215_vm1, %v166_v24 }
  0x33   :  { %990 = vmatmul.msk.f32.gmra.mxu2 %vm215_vm1, %v183_v25  ;;  %1006 = vmatmul.msk.f32.gmra.mxu3 %vm215_vm1, %v199_v26 }
  0x35   :  { %958 = vmatmul.msk.f32.gmra.mxu0 %vm215_vm1, %v151_v27  ;;  %974 = vmatmul.msk.f32.gmra.mxu1 %vm215_vm1, %v167_v28 }
  0x3b   :  { %991 = vmatmul.msk.f32.gmra.mxu2 %vm215_vm1, %v184_v29  ;;  %1007 = vmatmul.msk.f32.gmra.mxu3 %vm215_vm1, %v200_v30 }
  0x3d   :  { %959 = vmatmul.msk.f32.gmra.mxu0 %vm215_vm1, %v152_v31  ;;  %975 = vmatmul.msk.f32.gmra.mxu1 %vm215_vm1, %v168_v32 }
  0x43   :  { %992 = vmatmul.msk.f32.gmra.mxu2 %vm215_vm1, %v185_v33  ;;  %1008 = vmatmul.msk.f32.gmra.mxu3 %vm215_vm1, %v201_v34 }
  0x45   :  { %960 = vmatmul.msk.f32.gmra.mxu0 %vm215_vm1, %v153_v35  ;;  %976 = vmatmul.msk.f32.gmra.mxu1 %vm215_vm1, %v169_v36 }
  0x4b   :  { %993 = vmatmul.msk.f32.gmra.mxu2 %vm215_vm1, %v186_v37  ;;  %1009 = vmatmul.msk.f32.gmra.mxu3 %vm215_vm1, %v202_v38 }
  0x4d   :  { %961 = vmatmul.msk.f32.gmra.mxu0 %vm215_vm1, %v154_v39  ;;  %977 = vmatmul.msk.f32.gmra.mxu1 %vm215_vm1, %v170_v40 }
  0x53   :  { %994 = vmatmul.msk.f32.gmra.mxu2 %vm215_vm1, %v187_v41  ;;  %1010 = vmatmul.msk.f32.gmra.mxu3 %vm215_vm1, %v203_v42 }
  0x55   :  { %962 = vmatmul.msk.f32.gmra.mxu0 %vm215_vm1, %v155_v43  ;;  %978 = vmatmul.msk.f32.gmra.mxu1 %vm215_vm1, %v171_v44 }
  0x5b   :  { %995 = vmatmul.msk.f32.gmra.mxu2 %vm215_vm1, %v188_v45  ;;  %1011 = vmatmul.msk.f32.gmra.mxu3 %vm215_vm1, %v204_v46 }
  0x5d   :  { %963 = vmatmul.msk.f32.gmra.mxu0 %vm215_vm1, %v156_v47  ;;  %979 = vmatmul.msk.f32.gmra.mxu1 %vm215_vm1, %v172_v48 }
  0x63   :  { %996 = vmatmul.msk.f32.gmra.mxu2 %vm215_vm1, %v189_v49  ;;  %1012 = vmatmul.msk.f32.gmra.mxu3 %vm215_vm1, %v205_v50 }
  0x65   :  { %964 = vmatmul.msk.f32.gmra.mxu0 %vm215_vm1, %v157_v51  ;;  %980 = vmatmul.msk.f32.gmra.mxu1 %vm215_vm1, %v173_v52 }
  0x6b   :  { %997 = vmatmul.msk.f32.gmra.mxu2 %vm215_vm1, %v190_v53  ;;  %1013 = vmatmul.msk.f32.gmra.mxu3 %vm215_vm1, %v206_v54 }
  0x6d   :  { %965 = vmatmul.msk.f32.gmra.mxu0 %vm215_vm1, %v158_v55  ;;  %981 = vmatmul.msk.f32.gmra.mxu1 %vm215_vm1, %v174_v56 }
  0x73   :  { %998 = vmatmul.msk.f32.gmra.mxu2 %vm215_vm1, %v191_v57  ;;  %1014 = vmatmul.msk.f32.gmra.mxu3 %vm215_vm1, %v207_v58 }
  0x75   :  { %966 = vmatmul.msk.f32.gmra.mxu0 %vm215_vm1, %v159_v59  ;;  %982 = vmatmul.msk.f32.gmra.mxu1 %vm215_vm1, %v175_v60 }
  0x7b   :  { %999 = vmatmul.msk.f32.gmra.mxu2 %vm215_vm1, %v192_v61  ;;  %1015 = vmatmul.msk.f32.gmra.mxu3 %vm215_vm1, %v208_v62 }
  0x7d   :  { %967 = vmatmul.msk.f32.gmra.mxu0 %vm215_vm1, %v160_v63  ;;  %983 = vmatmul.msk.f32.gmra.mxu1 %vm215_vm1, %v176_v0 }
  0x83   :  { %1000 = vmatmul.msk.f32.gmra.mxu2 %vm215_vm1, %v193_v1  ;;  %1016 = vmatmul.msk.f32.gmra.mxu3 %vm215_vm1, %v209_v2 }
  0x85   :  { %968 = vmatmul.msk.f32.gmra.mxu0 %vm215_vm1, %v161_v3  ;;  %984 = vmatmul.msk.f32.gmra.mxu1 %vm215_vm1, %v177_v4 }
  0x8a   :  { %v429_v6 = vpop.f32.mrf.mxu0  ;;  %v477_v7 = vpop.f32.mrf.mxu1 }
  0x8b   :  { %v820_v8 = vadd.f32 %v1327_v5, %v429_v6  ;;  %v836_v9 = vadd.f32 %v1327_v5, %v477_v7 }
  0x8d   :  { %884 = vst [vmem:[%s1588_s3] sm:$0xff] %v820_v8 }
  0x8e   :  { %900 = vst [vmem:[%s1588_s3 + $0x80] sm:$0xff] %v836_v9  ;;  %v525_v10 = vpop.f32.mrf.mxu2  ;;  %v573_v11 = vpop.f32.mrf.mxu3 }
  0x8f   :  { %v852_v12 = vadd.f32 %v1327_v5, %v525_v10  ;;  %v868_v13 = vadd.f32 %v1327_v5, %v573_v11 }
  0x91   :  { %916 = vst [vmem:[%s1588_s3 + $0x100] sm:$0xff] %v852_v12 }
  0x92   :  { %932 = vst [vmem:[%s1588_s3 + $0x180] sm:$0xff] %v868_v13  ;;  %v432_v14 = vpop.f32.mrf.mxu0  ;;  %v480_v15 = vpop.f32.mrf.mxu1 }
  0x93   :  { %v821_v16 = vadd.f32 %v1327_v5, %v432_v14  ;;  %v837_v17 = vadd.f32 %v1327_v5, %v480_v15 }
  0x95   :  { %885 = vst [vmem:[%s1588_s3 + $0x8] sm:$0xff] %v821_v16 }
  0x96   :  { %901 = vst [vmem:[%s1588_s3 + $0x88] sm:$0xff] %v837_v17  ;;  %v528_v18 = vpop.f32.mrf.mxu2  ;;  %v576_v19 = vpop.f32.mrf.mxu3 }
  0x97   :  { %v853_v20 = vadd.f32 %v1327_v5, %v528_v18  ;;  %v869_v21 = vadd.f32 %v1327_v5, %v576_v19 }
  0x99   :  { %917 = vst [vmem:[%s1588_s3 + $0x108] sm:$0xff] %v853_v20 }
  0x9a   :  { %933 = vst [vmem:[%s1588_s3 + $0x188] sm:$0xff] %v869_v21  ;;  %v435_v22 = vpop.f32.mrf.mxu0  ;;  %v483_v23 = vpop.f32.mrf.mxu1 }
  0x9b   :  { %v822_v24 = vadd.f32 %v1327_v5, %v435_v22  ;;  %v838_v25 = vadd.f32 %v1327_v5, %v483_v23 }
  0x9d   :  { %886 = vst [vmem:[%s1588_s3 + $0x10] sm:$0xff] %v822_v24 }
  0x9e   :  { %902 = vst [vmem:[%s1588_s3 + $0x90] sm:$0xff] %v838_v25  ;;  %v531_v26 = vpop.f32.mrf.mxu2  ;;  %v579_v27 = vpop.f32.mrf.mxu3 }
  0x9f   :  { %v854_v28 = vadd.f32 %v1327_v5, %v531_v26  ;;  %v870_v29 = vadd.f32 %v1327_v5, %v579_v27 }
  0xa1   :  { %918 = vst [vmem:[%s1588_s3 + $0x110] sm:$0xff] %v854_v28 }
  0xa2   :  { %934 = vst [vmem:[%s1588_s3 + $0x190] sm:$0xff] %v870_v29  ;;  %v438_v30 = vpop.f32.mrf.mxu0  ;;  %v486_v31 = vpop.f32.mrf.mxu1 }
  0xa3   :  { %v823_v32 = vadd.f32 %v1327_v5, %v438_v30  ;;  %v839_v33 = vadd.f32 %v1327_v5, %v486_v31 }
  0xa5   :  { %887 = vst [vmem:[%s1588_s3 + $0x18] sm:$0xff] %v823_v32 }
  0xa6   :  { %903 = vst [vmem:[%s1588_s3 + $0x98] sm:$0xff] %v839_v33  ;;  %v534_v34 = vpop.f32.mrf.mxu2  ;;  %v582_v35 = vpop.f32.mrf.mxu3 }
  0xa7   :  { %v855_v36 = vadd.f32 %v1327_v5, %v534_v34  ;;  %v871_v37 = vadd.f32 %v1327_v5, %v582_v35 }
  0xa9   :  { %919 = vst [vmem:[%s1588_s3 + $0x118] sm:$0xff] %v855_v36 }
  0xaa   :  { %935 = vst [vmem:[%s1588_s3 + $0x198] sm:$0xff] %v871_v37  ;;  %v441_v38 = vpop.f32.mrf.mxu0  ;;  %v489_v39 = vpop.f32.mrf.mxu1 }
  0xab   :  { %v824_v40 = vadd.f32 %v1327_v5, %v441_v38  ;;  %v840_v41 = vadd.f32 %v1327_v5, %v489_v39 }
  0xad   :  { %888 = vst [vmem:[%s1588_s3 + $0x20] sm:$0xff] %v824_v40 }
  0xae   :  { %904 = vst [vmem:[%s1588_s3 + $0xa0] sm:$0xff] %v840_v41  ;;  %v537_v42 = vpop.f32.mrf.mxu2  ;;  %v585_v43 = vpop.f32.mrf.mxu3 }
  0xaf   :  { %v856_v44 = vadd.f32 %v1327_v5, %v537_v42  ;;  %v872_v45 = vadd.f32 %v1327_v5, %v585_v43 }
  0xb1   :  { %920 = vst [vmem:[%s1588_s3 + $0x120] sm:$0xff] %v856_v44 }
  0xb2   :  { %936 = vst [vmem:[%s1588_s3 + $0x1a0] sm:$0xff] %v872_v45  ;;  %v444_v46 = vpop.f32.mrf.mxu0  ;;  %v492_v47 = vpop.f32.mrf.mxu1 }
  0xb3   :  { %v825_v48 = vadd.f32 %v1327_v5, %v444_v46  ;;  %v841_v49 = vadd.f32 %v1327_v5, %v492_v47 }
  0xb5   :  { %889 = vst [vmem:[%s1588_s3 + $0x28] sm:$0xff] %v825_v48 }
  0xb6   :  { %905 = vst [vmem:[%s1588_s3 + $0xa8] sm:$0xff] %v841_v49  ;;  %v540_v50 = vpop.f32.mrf.mxu2  ;;  %v588_v51 = vpop.f32.mrf.mxu3 }
  0xb7   :  { %v857_v52 = vadd.f32 %v1327_v5, %v540_v50  ;;  %v873_v53 = vadd.f32 %v1327_v5, %v588_v51 }
  0xb9   :  { %921 = vst [vmem:[%s1588_s3 + $0x128] sm:$0xff] %v857_v52 }
  0xba   :  { %937 = vst [vmem:[%s1588_s3 + $0x1a8] sm:$0xff] %v873_v53  ;;  %v447_v54 = vpop.f32.mrf.mxu0  ;;  %v495_v55 = vpop.f32.mrf.mxu1 }
  0xbb   :  { %v826_v56 = vadd.f32 %v1327_v5, %v447_v54  ;;  %v842_v57 = vadd.f32 %v1327_v5, %v495_v55 }
  0xbd   :  { %890 = vst [vmem:[%s1588_s3 + $0x30] sm:$0xff] %v826_v56 }
  0xbe   :  { %906 = vst [vmem:[%s1588_s3 + $0xb0] sm:$0xff] %v842_v57  ;;  %v543_v58 = vpop.f32.mrf.mxu2  ;;  %v591_v59 = vpop.f32.mrf.mxu3 }
  0xbf   :  { %v858_v60 = vadd.f32 %v1327_v5, %v543_v58  ;;  %v874_v61 = vadd.f32 %v1327_v5, %v591_v59 }
  0xc1   :  { %922 = vst [vmem:[%s1588_s3 + $0x130] sm:$0xff] %v858_v60 }
  0xc2   :  { %938 = vst [vmem:[%s1588_s3 + $0x1b0] sm:$0xff] %v874_v61  ;;  %v450_v62 = vpop.f32.mrf.mxu0  ;;  %v498_v63 = vpop.f32.mrf.mxu1 }
  0xc3   :  { %v827_v0 = vadd.f32 %v1327_v5, %v450_v62  ;;  %v843_v1 = vadd.f32 %v1327_v5, %v498_v63 }
  0xc5   :  { %891 = vst [vmem:[%s1588_s3 + $0x38] sm:$0xff] %v827_v0 }
  0xc6   :  { %907 = vst [vmem:[%s1588_s3 + $0xb8] sm:$0xff] %v843_v1  ;;  %v546_v2 = vpop.f32.mrf.mxu2  ;;  %v594_v3 = vpop.f32.mrf.mxu3 }
  0xc7   :  { %v859_v4 = vadd.f32 %v1327_v5, %v546_v2  ;;  %v875_v6 = vadd.f32 %v1327_v5, %v594_v3 }
  0xc9   :  { %923 = vst [vmem:[%s1588_s3 + $0x138] sm:$0xff] %v859_v4 }
  0xca   :  { %939 = vst [vmem:[%s1588_s3 + $0x1b8] sm:$0xff] %v875_v6  ;;  %v453_v7 = vpop.f32.mrf.mxu0  ;;  %v501_v8 = vpop.f32.mrf.mxu1 }
  0xcb   :  { %v828_v9 = vadd.f32 %v1327_v5, %v453_v7  ;;  %v844_v10 = vadd.f32 %v1327_v5, %v501_v8 }
  0xcd   :  { %892 = vst [vmem:[%s1588_s3 + $0x40] sm:$0xff] %v828_v9 }
  0xce   :  { %908 = vst [vmem:[%s1588_s3 + $0xc0] sm:$0xff] %v844_v10  ;;  %v549_v11 = vpop.f32.mrf.mxu2  ;;  %v597_v12 = vpop.f32.mrf.mxu3 }
  0xcf   :  { %v860_v13 = vadd.f32 %v1327_v5, %v549_v11  ;;  %v876_v14 = vadd.f32 %v1327_v5, %v597_v12 }
  0xd1   :  { %924 = vst [vmem:[%s1588_s3 + $0x140] sm:$0xff] %v860_v13 }
  0xd2   :  { %940 = vst [vmem:[%s1588_s3 + $0x1c0] sm:$0xff] %v876_v14  ;;  %v456_v15 = vpop.f32.mrf.mxu0  ;;  %v504_v16 = vpop.f32.mrf.mxu1 }
  0xd3   :  { %v829_v17 = vadd.f32 %v1327_v5, %v456_v15  ;;  %v845_v18 = vadd.f32 %v1327_v5, %v504_v16 }
  0xd5   :  { %893 = vst [vmem:[%s1588_s3 + $0x48] sm:$0xff] %v829_v17 }
  0xd6   :  { %909 = vst [vmem:[%s1588_s3 + $0xc8] sm:$0xff] %v845_v18  ;;  %v552_v19 = vpop.f32.mrf.mxu2  ;;  %v600_v20 = vpop.f32.mrf.mxu3 }
  0xd7   :  { %v861_v21 = vadd.f32 %v1327_v5, %v552_v19  ;;  %v877_v22 = vadd.f32 %v1327_v5, %v600_v20 }
  0xd9   :  { %925 = vst [vmem:[%s1588_s3 + $0x148] sm:$0xff] %v861_v21 }
  0xda   :  { %941 = vst [vmem:[%s1588_s3 + $0x1c8] sm:$0xff] %v877_v22  ;;  %v459_v23 = vpop.f32.mrf.mxu0  ;;  %v507_v24 = vpop.f32.mrf.mxu1 }
  0xdb   :  { %v830_v25 = vadd.f32 %v1327_v5, %v459_v23  ;;  %v846_v26 = vadd.f32 %v1327_v5, %v507_v24 }
  0xdd   :  { %894 = vst [vmem:[%s1588_s3 + $0x50] sm:$0xff] %v830_v25 }
  0xde   :  { %910 = vst [vmem:[%s1588_s3 + $0xd0] sm:$0xff] %v846_v26  ;;  %v555_v27 = vpop.f32.mrf.mxu2  ;;  %v603_v28 = vpop.f32.mrf.mxu3 }
  0xdf   :  { %v862_v29 = vadd.f32 %v1327_v5, %v555_v27  ;;  %v878_v30 = vadd.f32 %v1327_v5, %v603_v28 }
  0xe1   :  { %926 = vst [vmem:[%s1588_s3 + $0x150] sm:$0xff] %v862_v29 }
  0xe2   :  { %942 = vst [vmem:[%s1588_s3 + $0x1d0] sm:$0xff] %v878_v30  ;;  %v462_v31 = vpop.f32.mrf.mxu0  ;;  %v510_v32 = vpop.f32.mrf.mxu1 }
  0xe3   :  { %v831_v33 = vadd.f32 %v1327_v5, %v462_v31  ;;  %v847_v34 = vadd.f32 %v1327_v5, %v510_v32 }
  0xe5   :  { %895 = vst [vmem:[%s1588_s3 + $0x58] sm:$0xff] %v831_v33 }
  0xe6   :  { %911 = vst [vmem:[%s1588_s3 + $0xd8] sm:$0xff] %v847_v34  ;;  %v558_v35 = vpop.f32.mrf.mxu2  ;;  %v606_v36 = vpop.f32.mrf.mxu3 }
  0xe7   :  { %v863_v37 = vadd.f32 %v1327_v5, %v558_v35  ;;  %v879_v38 = vadd.f32 %v1327_v5, %v606_v36 }
  0xe9   :  { %927 = vst [vmem:[%s1588_s3 + $0x158] sm:$0xff] %v863_v37 }
  0xea   :  { %943 = vst [vmem:[%s1588_s3 + $0x1d8] sm:$0xff] %v879_v38  ;;  %v465_v39 = vpop.f32.mrf.mxu0  ;;  %v513_v40 = vpop.f32.mrf.mxu1 }
  0xeb   :  { %v832_v41 = vadd.f32 %v1327_v5, %v465_v39  ;;  %v848_v42 = vadd.f32 %v1327_v5, %v513_v40 }
  0xed   :  { %896 = vst [vmem:[%s1588_s3 + $0x60] sm:$0xff] %v832_v41 }
  0xee   :  { %912 = vst [vmem:[%s1588_s3 + $0xe0] sm:$0xff] %v848_v42  ;;  %v561_v43 = vpop.f32.mrf.mxu2  ;;  %v609_v44 = vpop.f32.mrf.mxu3 }
  0xef   :  { %v864_v45 = vadd.f32 %v1327_v5, %v561_v43  ;;  %v880_v46 = vadd.f32 %v1327_v5, %v609_v44 }
  0xf1   :  { %928 = vst [vmem:[%s1588_s3 + $0x160] sm:$0xff] %v864_v45 }
  0xf2   :  { %944 = vst [vmem:[%s1588_s3 + $0x1e0] sm:$0xff] %v880_v46  ;;  %v468_v47 = vpop.f32.mrf.mxu0  ;;  %v516_v48 = vpop.f32.mrf.mxu1 }
  0xf3   :  { %v833_v49 = vadd.f32 %v1327_v5, %v468_v47  ;;  %v849_v50 = vadd.f32 %v1327_v5, %v516_v48 }
  0xf5   :  { %897 = vst [vmem:[%s1588_s3 + $0x68] sm:$0xff] %v833_v49 }
  0xf6   :  { %913 = vst [vmem:[%s1588_s3 + $0xe8] sm:$0xff] %v849_v50  ;;  %v564_v51 = vpop.f32.mrf.mxu2  ;;  %v612_v52 = vpop.f32.mrf.mxu3 }
  0xf7   :  { %v865_v53 = vadd.f32 %v1327_v5, %v564_v51  ;;  %v881_v54 = vadd.f32 %v1327_v5, %v612_v52 }
  0xf9   :  { %929 = vst [vmem:[%s1588_s3 + $0x168] sm:$0xff] %v865_v53 }
  0xfa   :  { %945 = vst [vmem:[%s1588_s3 + $0x1e8] sm:$0xff] %v881_v54  ;;  %v471_v55 = vpop.f32.mrf.mxu0  ;;  %v519_v56 = vpop.f32.mrf.mxu1 }
  0xfb   :  { %v834_v57 = vadd.f32 %v1327_v5, %v471_v55  ;;  %v850_v58 = vadd.f32 %v1327_v5, %v519_v56 }
  0xfd   :  { %898 = vst [vmem:[%s1588_s3 + $0x70] sm:$0xff] %v834_v57 }
  0xfe   :  { %914 = vst [vmem:[%s1588_s3 + $0xf0] sm:$0xff] %v850_v58  ;;  %v567_v59 = vpop.f32.mrf.mxu2  ;;  %v615_v60 = vpop.f32.mrf.mxu3 }
  0xff   :  { %v866_v61 = vadd.f32 %v1327_v5, %v567_v59  ;;  %v882_v62 = vadd.f32 %v1327_v5, %v615_v60 }
 0x101   :  { %930 = vst [vmem:[%s1588_s3 + $0x170] sm:$0xff] %v866_v61 }
 0x102   :  { %946 = vst [vmem:[%s1588_s3 + $0x1f0] sm:$0xff] %v882_v62  ;;  %v474_v63 = vpop.f32.mrf.mxu0  ;;  %v522_v0 = vpop.f32.mrf.mxu1 }
 0x103   :  { %v835_v1 = vadd.f32 %v1327_v5, %v474_v63  ;;  %v851_v2 = vadd.f32 %v1327_v5, %v522_v0 }
 0x105   :  { %899 = vst [vmem:[%s1588_s3 + $0x78] sm:$0xff] %v835_v1 }
 0x106   :  { %915 = vst [vmem:[%s1588_s3 + $0xf8] sm:$0xff] %v851_v2  ;;  %v570_v3 = vpop.f32.mrf.mxu2  ;;  %v618_v4 = vpop.f32.mrf.mxu3 }
 0x107   :  { %v867_v6 = vadd.f32 %v1327_v5, %v570_v3  ;;  %v883_v7 = vadd.f32 %v1327_v5, %v618_v4 }
 0x109   :  { %931 = vst [vmem:[%s1588_s3 + $0x178] sm:$0xff] %v867_v6 }
 0x10a   :  { %947 = vst [vmem:[%s1588_s3 + $0x1f8] sm:$0xff] %v883_v7 }

</bundles_post_ra>
